<compile_context>
chip_gen: v5e
topology: v5e:2x2
jax: 0.10.0
libtpu: 0.0.40
codegen_flags: <defaults>
</compile_context>

<pallas_src>
import functools

import jax
import jax.numpy as jnp
from jax.experimental import pallas as pl
from jax.experimental.pallas import tpu as pltpu

LEAKY_SLOPE = 0.01      # nn.LeakyReLU() default
BN_EPS = 1e-5           # nn.BatchNorm2d default


def _round_up(x, m):
    return (x + m - 1) // m * m


@functools.lru_cache(maxsize=None)
def _vmem_limit_bytes():
    """Generation-aware scoped-VMEM budget (~75% of physical, capped at 96 MiB)."""
    cap = 128 * 1024 * 1024
    try:
        cap = int(pltpu.get_tpu_info().vmem_capacity_bytes)
    except Exception:
        pass
    return max(32 * 1024 * 1024, min(cap * 3 // 4, 96 * 1024 * 1024))


# --------------------------------------------------------------------------- #
# Weight preparation: 3x3 HWIO conv weights -> 3 "W-Toeplitz" slabs.
#   slab kh : (Kpad, W*Cout) bf16, Kpad = round_up(W*Cin, 128)
#   slab kh maps the lane-major padded input row (lane = w*Cin + ci) directly to
#   the lane-major output row (lane = w*Cout + c).  SAME padding along W is
#   realized by simply omitting out-of-range taps (those weight rows stay zero).
# --------------------------------------------------------------------------- #
def _toeplitz_weights(w_hwio, width, k_pad):
    _, _, cin, cout = w_hwio.shape
    n = width * cout
    slabs = []
    for kh in range(3):
        m = jnp.zeros((k_pad, n), jnp.float32)
        for kw in range(3):
            for w in range(width):
                s = w + kw - 1                      # input column feeding output w
                if 0 <= s < width:
                    m = m.at[s * cin:(s + 1) * cin,
                             w * cout:(w + 1) * cout].set(w_hwio[kh, kw])
        slabs.append(m)
    return jnp.stack(slabs).astype(jnp.bfloat16)    # (3, Kpad, W*Cout)


# --------------------------------------------------------------------------- #
# Kernel: 3x3 SAME conv (stride 1) + bias + LeakyReLU (+ packed BN partial stats),
# with the previous stage's folded BatchNorm optionally fused on the input as a
# single per-channel FMA.  One image per grid step; everything lane-major.
# --------------------------------------------------------------------------- #
def _conv_stage_kernel(*refs, fuse_input_affine):
    if fuse_input_affine:
        (x_ref, inscale_ref, inshift_ref, w_ref, b_ref,
         act_ref, stats_ref, xpad_ref) = refs
    else:
        (x_ref, w_ref, b_ref, act_ref, stats_ref, xpad_ref) = refs
        inscale_ref = inshift_ref = None

    _, H, WCin = x_ref.shape
    WCout = act_ref.shape[-1]

    # Clear the padded-input scratch (zero halo rows + zero pad lanes).  One small
    # dense bf16 store per step; safe under megacore grid sharding (see header).
    xpad_ref[...] = jnp.zeros_like(xpad_ref)

    x = x_ref[0].astype(jnp.float32)                         # (H, W*Cin) f32
    if fuse_input_affine:
        # Previous stage's folded BatchNorm: one per-channel FMA in f32.
        x = x * inscale_ref[...] + inshift_ref[...]
    # Single cast to bf16, interior rows 1..H, lanes 0..W*Cin.
    xpad_ref[1:H + 1, 0:WCin] = x.astype(jnp.bfloat16)

    # Conv = 3 row-shifted MXU contractions (bf16 operands, f32 accumulation).
    # Output lanes come out already in (w*Cout + c) order -> no relayout.
    y = jnp.dot(xpad_ref[0:H, :], w_ref[0],
                preferred_element_type=jnp.float32)
    y = y + jnp.dot(xpad_ref[1:H + 1, :], w_ref[1],
                    preferred_element_type=jnp.float32)
    y = y + jnp.dot(xpad_ref[2:H + 2, :], w_ref[2],
                    preferred_element_type=jnp.float32)

    y = y + b_ref[...]                                       # conv bias
    y = jnp.where(y > 0, y, LEAKY_SLOPE * y)                 # LeakyReLU(0.01)

    # Lane-dense activation store: (1, H, W*Cout), last dim = 128 for this shape.
    act_ref[...] = y.reshape(1, H, WCout).astype(act_ref.dtype)

    # Per-image BatchNorm partial statistics in f32, packed lane-dense:
    # row 0 = sum over H, row 1 = sum of squares over H (per (w, c) lane).
    # The wrapper reduces over batch and W, so tiling never changes global stats.
    s = jnp.sum(y, axis=0, keepdims=True)
    ss = jnp.sum(y * y, axis=0, keepdims=True)
    stats_ref[...] = jnp.concatenate([s, ss], axis=0).reshape(1, 2, WCout)


def _conv_stage(x, w_t, b_row, H, W, Cin, Cout, act_dtype,
                in_scale=None, in_shift=None):
    """x: (N, H, W*Cin) bf16.  Returns (act (N,H,W*Cout) act_dtype,
    stats (N, 2, W*Cout) f32 [sum, sumsq] partially reduced over H)."""
    N = x.shape[0]
    WCin, WCout = W * Cin, W * Cout
    Kpad = w_t.shape[1]
    fuse = in_scale is not None
    kernel = functools.partial(_conv_stage_kernel, fuse_input_affine=fuse)

    in_specs = [pl.BlockSpec((1, H, WCin), lambda n: (n, 0, 0))]
    args = [x]
    if fuse:
        in_specs += [pl.BlockSpec((1, WCin), lambda n: (0, 0)),
                     pl.BlockSpec((1, WCin), lambda n: (0, 0))]
        args += [in_scale, in_shift]
    in_specs += [pl.BlockSpec((3, Kpad, WCout), lambda n: (0, 0, 0)),
                 pl.BlockSpec((1, WCout), lambda n: (0, 0))]
    args += [w_t, b_row]

    act, stats = pl.pallas_call(
        kernel,
        out_shape=(jax.ShapeDtypeStruct((N, H, WCout), act_dtype),
                   jax.ShapeDtypeStruct((N, 2, WCout), jnp.float32)),
        grid_spec=pltpu.PrefetchScalarGridSpec(
            num_scalar_prefetch=0,
            grid=(N,),                                   # TODO(synk): add H tiling
            in_specs=in_specs,
            out_specs=[pl.BlockSpec((1, H, WCout), lambda n: (n, 0, 0)),
                       pl.BlockSpec((1, 2, WCout), lambda n: (n, 0, 0))],
            scratch_shapes=[pltpu.VMEM((H + 2, Kpad), jnp.bfloat16)],
        ),
        compiler_params=pltpu.CompilerParams(
            dimension_semantics=("parallel",),           # images are independent
            vmem_limit_bytes=_vmem_limit_bytes(),
        ),
    )(*args)
    return act, stats


def _fold_bn(stats, gamma, beta, count, W, Cout):
    """Global batch stats + BN affine -> one per-channel scale/shift (f32)."""
    s = jnp.sum(stats[:, 0, :].reshape(-1, W, Cout), axis=(0, 1))
    ss = jnp.sum(stats[:, 1, :].reshape(-1, W, Cout), axis=(0, 1))
    mean = s / count
    var = ss / count - mean * mean               # biased var (training-mode BN)
    scale = gamma * jax.lax.rsqrt(var + BN_EPS)
    shift = beta - mean * scale
    return scale, shift


@jax.jit
def residual_block_forward(x_nchw, params):
    """residual_block forward.  x_nchw: (N, Cin, H, W) f32 -> (N, Cout, H, W) f32."""
    w1, b1, g1, be1, w2, b2, g2, be2 = params
    N, Cin, H, W = x_nchw.shape
    Cout = w1.shape[-1]
    count = float(N * H * W)
    WCout = W * Cout

    # NCHW -> lane-major (N, H, W*Cin), bf16 (the MXU consumes bf16 anyway).
    # TODO(synk): these layout transforms disappear if the surrounding model is NHWC.
    x = jnp.transpose(x_nchw, (0, 2, 3, 1)).reshape(N, H, W * Cin)
    x = x.astype(jnp.bfloat16)

    w1t = _toeplitz_weights(w1, W, _round_up(W * Cin, 128))     # (3, Kpad1, W*Cout)
    w2t = _toeplitz_weights(w2, W, _round_up(W * Cout, 128))    # (3, Kpad2, W*Cout)
    b1row = jnp.tile(b1, W).reshape(1, WCout).astype(jnp.float32)
    b2row = jnp.tile(b2, W).reshape(1, WCout).astype(jnp.float32)

    # Stage 1: conv1 + bias + LeakyReLU (+ stats).  bf16 activation (largest
    # intermediate); BN1 statistics are accumulated in f32 inside the kernel.
    act1, st1 = _conv_stage(x, w1t, b1row, H, W, Cin, Cout,
                            act_dtype=jnp.bfloat16)
    scale1, shift1 = _fold_bn(st1, g1, be1, count, W, Cout)

    # Stage 2: BN1 fused on the input (per-channel FMA) + conv2 + bias + LeakyReLU.
    act2, st2 = _conv_stage(
        act1, w2t, b2row, H, W, Cout, Cout, act_dtype=jnp.float32,
        in_scale=jnp.tile(scale1, W).reshape(1, WCout),
        in_shift=jnp.tile(shift1, W).reshape(1, WCout))
    scale2, shift2 = _fold_bn(st2, g2, be2, count, W, Cout)

    # BN2 as a plain-jnp per-channel FMA: XLA fuses it with the final transpose,
    # avoiding an extra full HBM round trip through a separate Pallas pass.
    y = act2.reshape(N, H, W, Cout) * scale2 + shift2
    return jnp.transpose(y, (0, 3, 1, 2))


# --------------------------------------------------------------------------- #
# Pure-JAX/XLA reference with the same numerics contract as the kernels:
# bf16 conv inputs, f32 accumulation, bf16 stage-1 intermediate, f32 BN math,
# training-mode BatchNorm (batch statistics).
# --------------------------------------------------------------------------- #
def _reference_forward(x_nchw, params):
    w1, b1, g1, be1, w2, b2, g2, be2 = params
    x = jnp.transpose(x_nchw, (0, 2, 3, 1))

    def conv(xi, w, b):
        y = jax.lax.conv_general_dilated(
            xi.astype(jnp.bfloat16), w.astype(jnp.bfloat16),
            window_strides=(1, 1), padding='SAME',
            dimension_numbers=('NHWC', 'HWIO', 'NHWC'),
            preferred_element_type=jnp.float32)
        return y + b.reshape(1, 1, 1, -1)

    def leaky(y):
        return jnp.where(y > 0, y, LEAKY_SLOPE * y)

    def bn_affine(y, g, be):
        mean = jnp.mean(y, axis=(0, 1, 2))
        var = jnp.mean(y * y, axis=(0, 1, 2)) - mean * mean
        scale = g * jax.lax.rsqrt(var + BN_EPS)
        shift = be - mean * scale
        return scale, shift

    y1 = leaky(conv(x, w1, b1))                              # f32
    s1, t1 = bn_affine(y1, g1, be1)                          # stats from f32 y1
    y1b = y1.astype(jnp.bfloat16).astype(jnp.float32)        # bf16 intermediate
    z1 = y1b * s1 + t1                                       # BN1 in f32

    y2 = leaky(conv(z1, w2, b2))
    s2, t2 = bn_affine(y2, g2, be2)
    z2 = y2 * s2 + t2
    return jnp.transpose(z2, (0, 3, 1, 2))


def init_params(key, in_c, out_c):
    ks = jax.random.split(key, 8)
    w1 = 0.1 * jax.random.normal(ks[0], (3, 3, in_c, out_c), jnp.float32)
    b1 = 0.05 * jax.random.normal(ks[1], (out_c,), jnp.float32)
    g1 = 1.0 + 0.1 * jax.random.normal(ks[2], (out_c,), jnp.float32)
    be1 = 0.05 * jax.random.normal(ks[3], (out_c,), jnp.float32)
    w2 = 0.1 * jax.random.normal(ks[4], (3, 3, out_c, out_c), jnp.float32)
    b2 = 0.05 * jax.random.normal(ks[5], (out_c,), jnp.float32)
    g2 = 1.0 + 0.1 * jax.random.normal(ks[6], (out_c,), jnp.float32)
    be2 = 0.05 * jax.random.normal(ks[7], (out_c,), jnp.float32)
    return (w1, b1, g1, be1, w2, b2, g2, be2)


if __name__ == "__main__":
    key = jax.random.PRNGKey(0)
    k_x, k_p = jax.random.split(key)

    N, in_c, out_c, S = 2, 4, 8, 16            # x is (2, 4, 16, 16) NCHW
    x = jax.random.normal(k_x, (N, in_c, S, S), jnp.float32)
    params = init_params(k_p, in_c, out_c)

    out = jax.block_until_ready(residual_block_forward(x, params))
    ref = jax.block_until_ready(_reference_forward(x, params))

    assert out.shape == (N, out_c, S, S)
    err = float(jnp.max(jnp.abs(out - ref)))
    assert jnp.allclose(out, ref, rtol=2e-3, atol=2e-3), f"max abs diff {err}"

    print("KERNEL_OK")
</pallas_src>

<mosaic_0001>
module attributes {stable_mosaic.version = 11 : i64} {
  func.func @_conv_stage_kernel(%arg0: i32, %arg1: memref<1x16x64xbf16, #tpu.memory_space<vmem>>, %arg2: memref<3x128x128xbf16, #tpu.memory_space<vmem>>, %arg3: memref<1x128xf32, #tpu.memory_space<vmem>>, %arg4: memref<1x16x128xbf16, #tpu.memory_space<vmem>>, %arg5: memref<1x2x128xf32, #tpu.memory_space<vmem>>, %arg6: memref<18x128xbf16, #tpu.memory_space<vmem>>) attributes {dimension_semantics = [#tpu.dimension_semantics<parallel>], iteration_bounds = array<i64: 2>, scalar_prefetch = 0 : i64, scratch_operands = 1 : i64, tpu.core_type = #tpu.core_type<tc>, window_params = [{transform_indices = @transform_0, window_bounds = array<i64: 1, 16, 64>}, {pipeline_mode = #tpu.pipeline_mode<synchronous>, transform_indices = @transform_1, window_bounds = array<i64: 3, 128, 128>}, {pipeline_mode = #tpu.pipeline_mode<synchronous>, transform_indices = @transform_2, window_bounds = array<i64: 1, 128>}, {transform_indices = @transform_3, window_bounds = array<i64: 1, 16, 128>}, {transform_indices = @transform_4, window_bounds = array<i64: 1, 2, 128>}]} {
    %cst = arith.constant 0.000000e+00 : bf16
    %0 = vector.broadcast %cst : bf16 to vector<18x128xbf16>
    %c0 = arith.constant 0 : index
    %c0_0 = arith.constant 0 : index
    %1 = vector.load %arg6[%c0, %c0_0] : memref<18x128xbf16, #tpu.memory_space<vmem>>, vector<18x128xbf16>
    tpu.vector_store %arg6[%c0, %c0_0], %0 {strides = array<i32>} : memref<18x128xbf16, #tpu.memory_space<vmem>>, vector<18x128xbf16>,
    %c0_1 = arith.constant 0 : index
    %c0_2 = arith.constant 0 : index
    %c0_3 = arith.constant 0 : index
    %2 = vector.load %arg1[%c0_1, %c0_2, %c0_3] : memref<1x16x64xbf16, #tpu.memory_space<vmem>>, vector<1x16x64xbf16>
    %3 = vector.shape_cast %2 : vector<1x16x64xbf16> to vector<16x64xbf16>
    %4 = arith.extf %3 : vector<16x64xbf16> to vector<16x64xf32>
    %5 = arith.truncf %4 : vector<16x64xf32> to vector<16x64xbf16>
    %c1 = arith.constant 1 : index
    %c0_4 = arith.constant 0 : index
    %6 = vector.load %arg6[%c1, %c0_4] : memref<18x128xbf16, #tpu.memory_space<vmem>>, vector<16x64xbf16>
    tpu.vector_store %arg6[%c1, %c0_4], %5 {strides = array<i32>} : memref<18x128xbf16, #tpu.memory_space<vmem>>, vector<16x64xbf16>,
    %c0_5 = arith.constant 0 : index
    %c0_6 = arith.constant 0 : index
    %7 = vector.load %arg6[%c0_5, %c0_6] : memref<18x128xbf16, #tpu.memory_space<vmem>>, vector<16x128xbf16>
    %c0_7 = arith.constant 0 : index
    %c0_8 = arith.constant 0 : index
    %c0_9 = arith.constant 0 : index
    %8 = vector.load %arg2[%c0_7, %c0_8, %c0_9] : memref<3x128x128xbf16, #tpu.memory_space<vmem>>, vector<1x128x128xbf16>
    %9 = vector.shape_cast %8 : vector<1x128x128xbf16> to vector<128x128xbf16>
    %cst_10 = arith.constant dense<0.000000e+00> : vector<16x128xf32>
    %10 = tpu.matmul %7, %9, %cst_10 {dimension_numbers = #tpu.dot_dimension_numbers<[1], [0], [0], [1], [0, 0, 1, 1], [], []>} : vector<16x128xbf16>, vector<128x128xbf16>, vector<16x128xf32> -> vector<16x128xf32>
    %c1_11 = arith.constant 1 : index
    %c0_12 = arith.constant 0 : index
    %11 = vector.load %arg6[%c1_11, %c0_12] : memref<18x128xbf16, #tpu.memory_space<vmem>>, vector<16x128xbf16>
    %c1_13 = arith.constant 1 : index
    %c0_14 = arith.constant 0 : index
    %c0_15 = arith.constant 0 : index
    %12 = vector.load %arg2[%c1_13, %c0_14, %c0_15] : memref<3x128x128xbf16, #tpu.memory_space<vmem>>, vector<1x128x128xbf16>
    %13 = vector.shape_cast %12 : vector<1x128x128xbf16> to vector<128x128xbf16>
    %cst_16 = arith.constant dense<0.000000e+00> : vector<16x128xf32>
    %14 = tpu.matmul %11, %13, %cst_16 {dimension_numbers = #tpu.dot_dimension_numbers<[1], [0], [0], [1], [0, 0, 1, 1], [], []>} : vector<16x128xbf16>, vector<128x128xbf16>, vector<16x128xf32> -> vector<16x128xf32>
    %15 = arith.addf %10, %14 : vector<16x128xf32>
    %c2 = arith.constant 2 : index
    %c0_17 = arith.constant 0 : index
    %16 = vector.load %arg6[%c2, %c0_17] : memref<18x128xbf16, #tpu.memory_space<vmem>>, vector<16x128xbf16>
    %c2_18 = arith.constant 2 : index
    %c0_19 = arith.constant 0 : index
    %c0_20 = arith.constant 0 : index
    %17 = vector.load %arg2[%c2_18, %c0_19, %c0_20] : memref<3x128x128xbf16, #tpu.memory_space<vmem>>, vector<1x128x128xbf16>
    %18 = vector.shape_cast %17 : vector<1x128x128xbf16> to vector<128x128xbf16>
    %cst_21 = arith.constant dense<0.000000e+00> : vector<16x128xf32>
    %19 = tpu.matmul %16, %18, %cst_21 {dimension_numbers = #tpu.dot_dimension_numbers<[1], [0], [0], [1], [0, 0, 1, 1], [], []>} : vector<16x128xbf16>, vector<128x128xbf16>, vector<16x128xf32> -> vector<16x128xf32>
    %20 = arith.addf %15, %19 : vector<16x128xf32>
    %c0_22 = arith.constant 0 : index
    %c0_23 = arith.constant 0 : index
    %21 = vector.load %arg3[%c0_22, %c0_23] : memref<1x128xf32, #tpu.memory_space<vmem>>, vector<1x128xf32>
    %22 = vector.broadcast %21 : vector<1x128xf32> to vector<16x128xf32>
    %23 = arith.addf %20, %22 : vector<16x128xf32>
    %cst_24 = arith.constant 0.000000e+00 : f32
    %24 = vector.broadcast %cst_24 : f32 to vector<16x128xf32>
    %25 = arith.cmpf ogt, %23, %24 : vector<16x128xf32>
    %cst_25 = arith.constant 0.00999999977 : f32
    %26 = vector.broadcast %cst_25 : f32 to vector<16x128xf32>
    %27 = arith.mulf %26, %23 : vector<16x128xf32>
    %28 = arith.select %25, %23, %27 : vector<16x128xi1>, vector<16x128xf32>
    %29 = vector.shape_cast %28 : vector<16x128xf32> to vector<1x16x128xf32>
    %30 = arith.truncf %29 : vector<1x16x128xf32> to vector<1x16x128xbf16>
    %c0_26 = arith.constant 0 : index
    %c0_27 = arith.constant 0 : index
    %c0_28 = arith.constant 0 : index
    %31 = vector.load %arg4[%c0_26, %c0_27, %c0_28] : memref<1x16x128xbf16, #tpu.memory_space<vmem>>, vector<1x16x128xbf16>
    tpu.vector_store %arg4[%c0_26, %c0_27, %c0_28], %30 {strides = array<i32>} : memref<1x16x128xbf16, #tpu.memory_space<vmem>>, vector<1x16x128xbf16>,
    %cst_29 = arith.constant dense<0.000000e+00> : vector<128xf32>
    %32 = vector.multi_reduction <add>, %28, %cst_29 [0] : vector<16x128xf32> to vector<128xf32>
    %33 = vector.shape_cast %32 : vector<128xf32> to vector<1x128xf32>
    %34 = arith.mulf %28, %28 : vector<16x128xf32>
    %cst_30 = arith.constant dense<0.000000e+00> : vector<128xf32>
    %35 = vector.multi_reduction <add>, %34, %cst_30 [0] : vector<16x128xf32> to vector<128xf32>
    %36 = vector.shape_cast %35 : vector<128xf32> to vector<1x128xf32>
    %37 = tpu.concatenate %33, %36 in 0 : vector<1x128xf32>, vector<1x128xf32> -> vector<2x128xf32>
    %38 = vector.shape_cast %37 : vector<2x128xf32> to vector<1x2x128xf32>
    %c0_31 = arith.constant 0 : index
    %c0_32 = arith.constant 0 : index
    %c0_33 = arith.constant 0 : index
    %39 = vector.load %arg5[%c0_31, %c0_32, %c0_33] : memref<1x2x128xf32, #tpu.memory_space<vmem>>, vector<1x2x128xf32>
    tpu.vector_store %arg5[%c0_31, %c0_32, %c0_33], %38 {strides = array<i32>} : memref<1x2x128xf32, #tpu.memory_space<vmem>>, vector<1x2x128xf32>,
    return
  }
  func.func @transform_0(%arg0: i32) -> (i32, i32, i32) {
    %c0_i32 = arith.constant 0 : i32
    %c0_i32_0 = arith.constant 0 : i32
    %c0_i32_1 = arith.constant 0 : i32
    return %arg0, %c0_i32, %c0_i32_0 : i32, i32, i32
  }
  func.func @transform_1(%arg0: i32) -> (i32, i32, i32) {
    %c0_i32 = arith.constant 0 : i32
    %c0_i32_0 = arith.constant 0 : i32
    %c0_i32_1 = arith.constant 0 : i32
    %c0_i32_2 = arith.constant 0 : i32
    return %c0_i32, %c0_i32_0, %c0_i32_1 : i32, i32, i32
  }
  func.func @transform_2(%arg0: i32) -> (i32, i32) {
    %c0_i32 = arith.constant 0 : i32
    %c0_i32_0 = arith.constant 0 : i32
    %c0_i32_1 = arith.constant 0 : i32
    return %c0_i32, %c0_i32_0 : i32, i32
  }
  func.func @transform_3(%arg0: i32) -> (i32, i32, i32) {
    %c0_i32 = arith.constant 0 : i32
    %c0_i32_0 = arith.constant 0 : i32
    %c0_i32_1 = arith.constant 0 : i32
    return %arg0, %c0_i32, %c0_i32_0 : i32, i32, i32
  }
  func.func @transform_4(%arg0: i32) -> (i32, i32, i32) {
    %c0_i32 = arith.constant 0 : i32
    %c0_i32_0 = arith.constant 0 : i32
    %c0_i32_1 = arith.constant 0 : i32
    return %arg0, %c0_i32, %c0_i32_0 : i32, i32, i32
  }
}

module attributes {stable_mosaic.version = 11 : i64} {
  func.func @_conv_stage_kernel(%arg0: i32, %arg1: memref<1x16x128xbf16, #tpu.memory_space<vmem>>, %arg2: memref<1x128xf32, #tpu.memory_space<vmem>>, %arg3: memref<1x128xf32, #tpu.memory_space<vmem>>, %arg4: memref<3x128x128xbf16, #tpu.memory_space<vmem>>, %arg5: memref<1x128xf32, #tpu.memory_space<vmem>>, %arg6: memref<1x16x128xf32, #tpu.memory_space<vmem>>, %arg7: memref<1x2x128xf32, #tpu.memory_space<vmem>>, %arg8: memref<18x128xbf16, #tpu.memory_space<vmem>>) attributes {dimension_semantics = [#tpu.dimension_semantics<parallel>], iteration_bounds = array<i64: 2>, scalar_prefetch = 0 : i64, scratch_operands = 1 : i64, tpu.core_type = #tpu.core_type<tc>, window_params = [{transform_indices = @transform_0, window_bounds = array<i64: 1, 16, 128>}, {pipeline_mode = #tpu.pipeline_mode<synchronous>, transform_indices = @transform_1, window_bounds = array<i64: 1, 128>}, {pipeline_mode = #tpu.pipeline_mode<synchronous>, transform_indices = @transform_2, window_bounds = array<i64: 1, 128>}, {pipeline_mode = #tpu.pipeline_mode<synchronous>, transform_indices = @transform_3, window_bounds = array<i64: 3, 128, 128>}, {pipeline_mode = #tpu.pipeline_mode<synchronous>, transform_indices = @transform_4, window_bounds = array<i64: 1, 128>}, {transform_indices = @transform_5, window_bounds = array<i64: 1, 16, 128>}, {transform_indices = @transform_6, window_bounds = array<i64: 1, 2, 128>}]} {
    %cst = arith.constant 0.000000e+00 : bf16
    %0 = vector.broadcast %cst : bf16 to vector<18x128xbf16>
    %c0 = arith.constant 0 : index
    %c0_0 = arith.constant 0 : index
    %1 = vector.load %arg8[%c0, %c0_0] : memref<18x128xbf16, #tpu.memory_space<vmem>>, vector<18x128xbf16>
    tpu.vector_store %arg8[%c0, %c0_0], %0 {strides = array<i32>} : memref<18x128xbf16, #tpu.memory_space<vmem>>, vector<18x128xbf16>,
    %c0_1 = arith.constant 0 : index
    %c0_2 = arith.constant 0 : index
    %c0_3 = arith.constant 0 : index
    %2 = vector.load %arg1[%c0_1, %c0_2, %c0_3] : memref<1x16x128xbf16, #tpu.memory_space<vmem>>, vector<1x16x128xbf16>
    %3 = vector.shape_cast %2 : vector<1x16x128xbf16> to vector<16x128xbf16>
    %4 = arith.extf %3 : vector<16x128xbf16> to vector<16x128xf32>
    %c0_4 = arith.constant 0 : index
    %c0_5 = arith.constant 0 : index
    %5 = vector.load %arg2[%c0_4, %c0_5] : memref<1x128xf32, #tpu.memory_space<vmem>>, vector<1x128xf32>
    %6 = vector.broadcast %5 : vector<1x128xf32> to vector<16x128xf32>
    %7 = arith.mulf %4, %6 : vector<16x128xf32>
    %c0_6 = arith.constant 0 : index
    %c0_7 = arith.constant 0 : index
    %8 = vector.load %arg3[%c0_6, %c0_7] : memref<1x128xf32, #tpu.memory_space<vmem>>, vector<1x128xf32>
    %9 = vector.broadcast %8 : vector<1x128xf32> to vector<16x128xf32>
    %10 = arith.addf %7, %9 : vector<16x128xf32>
    %11 = arith.truncf %10 : vector<16x128xf32> to vector<16x128xbf16>
    %c1 = arith.constant 1 : index
    %c0_8 = arith.constant 0 : index
    %12 = vector.load %arg8[%c1, %c0_8] : memref<18x128xbf16, #tpu.memory_space<vmem>>, vector<16x128xbf16>
    tpu.vector_store %arg8[%c1, %c0_8], %11 {strides = array<i32>} : memref<18x128xbf16, #tpu.memory_space<vmem>>, vector<16x128xbf16>,
    %c0_9 = arith.constant 0 : index
    %c0_10 = arith.constant 0 : index
    %13 = vector.load %arg8[%c0_9, %c0_10] : memref<18x128xbf16, #tpu.memory_space<vmem>>, vector<16x128xbf16>
    %c0_11 = arith.constant 0 : index
    %c0_12 = arith.constant 0 : index
    %c0_13 = arith.constant 0 : index
    %14 = vector.load %arg4[%c0_11, %c0_12, %c0_13] : memref<3x128x128xbf16, #tpu.memory_space<vmem>>, vector<1x128x128xbf16>
    %15 = vector.shape_cast %14 : vector<1x128x128xbf16> to vector<128x128xbf16>
    %cst_14 = arith.constant dense<0.000000e+00> : vector<16x128xf32>
    %16 = tpu.matmul %13, %15, %cst_14 {dimension_numbers = #tpu.dot_dimension_numbers<[1], [0], [0], [1], [0, 0, 1, 1], [], []>} : vector<16x128xbf16>, vector<128x128xbf16>, vector<16x128xf32> -> vector<16x128xf32>
    %c1_15 = arith.constant 1 : index
    %c0_16 = arith.constant 0 : index
    %17 = vector.load %arg8[%c1_15, %c0_16] : memref<18x128xbf16, #tpu.memory_space<vmem>>, vector<16x128xbf16>
    %c1_17 = arith.constant 1 : index
    %c0_18 = arith.constant 0 : index
    %c0_19 = arith.constant 0 : index
    %18 = vector.load %arg4[%c1_17, %c0_18, %c0_19] : memref<3x128x128xbf16, #tpu.memory_space<vmem>>, vector<1x128x128xbf16>
    %19 = vector.shape_cast %18 : vector<1x128x128xbf16> to vector<128x128xbf16>
    %cst_20 = arith.constant dense<0.000000e+00> : vector<16x128xf32>
    %20 = tpu.matmul %17, %19, %cst_20 {dimension_numbers = #tpu.dot_dimension_numbers<[1], [0], [0], [1], [0, 0, 1, 1], [], []>} : vector<16x128xbf16>, vector<128x128xbf16>, vector<16x128xf32> -> vector<16x128xf32>
    %21 = arith.addf %16, %20 : vector<16x128xf32>
    %c2 = arith.constant 2 : index
    %c0_21 = arith.constant 0 : index
    %22 = vector.load %arg8[%c2, %c0_21] : memref<18x128xbf16, #tpu.memory_space<vmem>>, vector<16x128xbf16>
    %c2_22 = arith.constant 2 : index
    %c0_23 = arith.constant 0 : index
    %c0_24 = arith.constant 0 : index
    %23 = vector.load %arg4[%c2_22, %c0_23, %c0_24] : memref<3x128x128xbf16, #tpu.memory_space<vmem>>, vector<1x128x128xbf16>
    %24 = vector.shape_cast %23 : vector<1x128x128xbf16> to vector<128x128xbf16>
    %cst_25 = arith.constant dense<0.000000e+00> : vector<16x128xf32>
    %25 = tpu.matmul %22, %24, %cst_25 {dimension_numbers = #tpu.dot_dimension_numbers<[1], [0], [0], [1], [0, 0, 1, 1], [], []>} : vector<16x128xbf16>, vector<128x128xbf16>, vector<16x128xf32> -> vector<16x128xf32>
    %26 = arith.addf %21, %25 : vector<16x128xf32>
    %c0_26 = arith.constant 0 : index
    %c0_27 = arith.constant 0 : index
    %27 = vector.load %arg5[%c0_26, %c0_27] : memref<1x128xf32, #tpu.memory_space<vmem>>, vector<1x128xf32>
    %28 = vector.broadcast %27 : vector<1x128xf32> to vector<16x128xf32>
    %29 = arith.addf %26, %28 : vector<16x128xf32>
    %cst_28 = arith.constant 0.000000e+00 : f32
    %30 = vector.broadcast %cst_28 : f32 to vector<16x128xf32>
    %31 = arith.cmpf ogt, %29, %30 : vector<16x128xf32>
    %cst_29 = arith.constant 0.00999999977 : f32
    %32 = vector.broadcast %cst_29 : f32 to vector<16x128xf32>
    %33 = arith.mulf %32, %29 : vector<16x128xf32>
    %34 = arith.select %31, %29, %33 : vector<16x128xi1>, vector<16x128xf32>
    %35 = vector.shape_cast %34 : vector<16x128xf32> to vector<1x16x128xf32>
    %c0_30 = arith.constant 0 : index
    %c0_31 = arith.constant 0 : index
    %c0_32 = arith.constant 0 : index
    %36 = vector.load %arg6[%c0_30, %c0_31, %c0_32] : memref<1x16x128xf32, #tpu.memory_space<vmem>>, vector<1x16x128xf32>
    tpu.vector_store %arg6[%c0_30, %c0_31, %c0_32], %35 {strides = array<i32>} : memref<1x16x128xf32, #tpu.memory_space<vmem>>, vector<1x16x128xf32>,
    %cst_33 = arith.constant dense<0.000000e+00> : vector<128xf32>
    %37 = vector.multi_reduction <add>, %34, %cst_33 [0] : vector<16x128xf32> to vector<128xf32>
    %38 = vector.shape_cast %37 : vector<128xf32> to vector<1x128xf32>
    %39 = arith.mulf %34, %34 : vector<16x128xf32>
    %cst_34 = arith.constant dense<0.000000e+00> : vector<128xf32>
    %40 = vector.multi_reduction <add>, %39, %cst_34 [0] : vector<16x128xf32> to vector<128xf32>
    %41 = vector.shape_cast %40 : vector<128xf32> to vector<1x128xf32>
    %42 = tpu.concatenate %38, %41 in 0 : vector<1x128xf32>, vector<1x128xf32> -> vector<2x128xf32>
    %43 = vector.shape_cast %42 : vector<2x128xf32> to vector<1x2x128xf32>
    %c0_35 = arith.constant 0 : index
    %c0_36 = arith.constant 0 : index
    %c0_37 = arith.constant 0 : index
    %44 = vector.load %arg7[%c0_35, %c0_36, %c0_37] : memref<1x2x128xf32, #tpu.memory_space<vmem>>, vector<1x2x128xf32>
    tpu.vector_store %arg7[%c0_35, %c0_36, %c0_37], %43 {strides = array<i32>} : memref<1x2x128xf32, #tpu.memory_space<vmem>>, vector<1x2x128xf32>,
    return
  }
  func.func @transform_0(%arg0: i32) -> (i32, i32, i32) {
    %c0_i32 = arith.constant 0 : i32
    %c0_i32_0 = arith.constant 0 : i32
    %c0_i32_1 = arith.constant 0 : i32
    return %arg0, %c0_i32, %c0_i32_0 : i32, i32, i32
  }
  func.func @transform_1(%arg0: i32) -> (i32, i32) {
    %c0_i32 = arith.constant 0 : i32
    %c0_i32_0 = arith.constant 0 : i32
    %c0_i32_1 = arith.constant 0 : i32
    return %c0_i32, %c0_i32_0 : i32, i32
  }
  func.func @transform_2(%arg0: i32) -> (i32, i32) {
    %c0_i32 = arith.constant 0 : i32
    %c0_i32_0 = arith.constant 0 : i32
    %c0_i32_1 = arith.constant 0 : i32
    return %c0_i32, %c0_i32_0 : i32, i32
  }
  func.func @transform_3(%arg0: i32) -> (i32, i32, i32) {
    %c0_i32 = arith.constant 0 : i32
    %c0_i32_0 = arith.constant 0 : i32
    %c0_i32_1 = arith.constant 0 : i32
    %c0_i32_2 = arith.constant 0 : i32
    return %c0_i32, %c0_i32_0, %c0_i32_1 : i32, i32, i32
  }
  func.func @transform_4(%arg0: i32) -> (i32, i32) {
    %c0_i32 = arith.constant 0 : i32
    %c0_i32_0 = arith.constant 0 : i32
    %c0_i32_1 = arith.constant 0 : i32
    return %c0_i32, %c0_i32_0 : i32, i32
  }
  func.func @transform_5(%arg0: i32) -> (i32, i32, i32) {
    %c0_i32 = arith.constant 0 : i32
    %c0_i32_0 = arith.constant 0 : i32
    %c0_i32_1 = arith.constant 0 : i32
    return %arg0, %c0_i32, %c0_i32_0 : i32, i32, i32
  }
  func.func @transform_6(%arg0: i32) -> (i32, i32, i32) {
    %c0_i32 = arith.constant 0 : i32
    %c0_i32_0 = arith.constant 0 : i32
    %c0_i32_1 = arith.constant 0 : i32
    return %arg0, %c0_i32, %c0_i32_0 : i32, i32, i32
  }
}

</mosaic_0001>

<bundles_post_ra>
// kernel: tile.23
= control target key start
LH: loop header
LB: loop body
LE: loop exit
PB: predicated region body
PF: predicated region fallthrough
CT: control target
= control target key end

     0   :  { %s28_s0 = inlined_call_operand.vmem [shape: f32[8], index: 0, kind: input, shape index: {}]   ;;  %s29_s1 = inlined_call_operand.vmem [shape: f32[16,8], index: 1, kind: output, shape index: {}]  }
   0x1   :  { %v4_v0 = vld [vmem:[%s28_s0] ss:$0 sm:$0xff] }
   0x2   :  { %5 = vst [vmem:[%s29_s1] sm:$0xff] %v4_v0 }
   0x3   :  { %8 = vst [vmem:[%s29_s1 + $0x8] sm:$0xff] %v4_v0 }

// kernel: tile.24
= control target key start
LH: loop header
LB: loop body
LE: loop exit
PB: predicated region body
PF: predicated region fallthrough
CT: control target
= control target key end

     0   :  { %s131_s10 = smov 120   ;;  %s132_s11 = smov 104   ;;  %vm3_vm0 = vcmask 64512   ;;  %vm9_vm1 = vcmask 1048512   ;;  %vm15_vm2 = vcmask 982912   ;;  %vm21_vm3 = vcmask 917312   ;;  %s207_s0 = inlined_call_operand.vmem [shape: f32[16,8], index: 0, kind: input, shape index: {}]   ;;  %s208_s1 = inlined_call_operand.vmem [shape: f32[1,128], index: 1, kind: output, shape index: {}]  }
   0x1   :  { %v101_v0 = vld [vmem:[%s207_s0 + $0xf] sm:$0x1]   ;;  %v103_v1 = vld [vmem:[%s207_s0 + $0xd] sm:$0x1]   ;;  %v105_v2 = vld [vmem:[%s207_s0 + $0xb] sm:$0x1]  }
   0x2   :  { %7 = vrot.lane.b32.xlu0 %v101_v0, %s131_s10  ;;  %19 = vrot.lane.b32.xlu1 %v103_v1, %s132_s11  ;;  %s133_s14 = smov 88   ;;  %v102_v3 = vld [vmem:[%s207_s0 + $0xe] sm:$0x1]   ;;  %v104_v4 = vld [vmem:[%s207_s0 + $0xc] sm:$0x1]   ;;  %s134_s19 = smov 112  }
   0x3   :  { %31 = vrot.lane.b32.xlu2 %v105_v2, %s133_s14  ;;  %s135_s20 = smov 96   ;;  %v106_v5 = vld [vmem:[%s207_s0 + $0xa] sm:$0x1]   ;;  %s136_s23 = smov 80   ;;  %v107_v6 = vld [vmem:[%s207_s0 + $0x9] sm:$0x1]  }
   0x4   :  { %v108_v7 = vld [vmem:[%s207_s0 + $0x8] sm:$0x1]   ;;  %s137_s28 = smov 72   ;;  %s138_s29 = smov 64   ;;  %v109_v8 = vld [vmem:[%s207_s0 + $0x7] sm:$0x1]  }
   0x5   :  { %s139_s3 = smov 56   ;;  %v110_v9 = vld [vmem:[%s207_s0 + $0x6] sm:$0x1]   ;;  %v111_v10 = vld [vmem:[%s207_s0 + $0x5] sm:$0x1]   ;;  %s140_s8 = smov 48  }
   0x6   :  { %s141_s9 = smov 40   ;;  %v112_v11 = vld [vmem:[%s207_s0 + $0x4] sm:$0x1]   ;;  %s142_s12 = smov 32   ;;  %v113_v12 = vld [vmem:[%s207_s0 + $0x3] sm:$0x1]  }
   0x7   :  { %v114_v13 = vld [vmem:[%s207_s0 + $0x2] sm:$0x1]   ;;  %s143_s17 = smov 24   ;;  %s144_s18 = smov 16   ;;  %v115_v14 = vld [vmem:[%s207_s0 + $0x1] sm:$0x1]  }
   0x8   :  { %s145_s21 = smov 8   ;;  %v2_v15 = vld [vmem:[%s207_s0] sm:$0x1]   ;;  %vm27_vm4 = vcmask 851712   ;;  %vm33_vm5 = vcmask 786112   ;;  %vm39_vm6 = vcmask 720512  }
   0x9   :  { %4 = vst.msk [vmem:[#allocation0] sm:$0x1] %vm3_vm0, %v2_v15   ;;  %vm45_vm7 = vcmask 654912   ;;  %vm51_vm8 = vcmask 589312   ;;  %vm57_vm9 = vcmask 523712   ;;  %vm63_vm10 = vcmask 458112  }
   0xa   :  { %13 = vrot.lane.b32.xlu0 %v102_v3, %s134_s19  ;;  %25 = vrot.lane.b32.xlu1 %v104_v4, %s135_s20  ;;  %vm69_vm11 = vcmask 392512   ;;  %vm75_vm12 = vcmask 326912   ;;  %vm81_vm13 = vcmask 261312   ;;  %vm87_vm14 = vcmask 195712  }
   0xb   :  { %37 = vrot.lane.b32.xlu2 %v106_v5, %s136_s23  ;;  %vm93_vm15 = vcmask 130112  }
  0x12   :  { %43 = vrot.lane.b32.xlu0 %v107_v6, %s137_s28  ;;  %49 = vrot.lane.b32.xlu1 %v108_v7, %s138_s29 }
  0x13   :  { %55 = vrot.lane.b32.xlu2 %v109_v8, %s139_s3 }
  0x1a   :  { %61 = vrot.lane.b32.xlu0 %v110_v9, %s140_s8  ;;  %67 = vrot.lane.b32.xlu1 %v111_v10, %s141_s9 }
  0x1b   :  { %73 = vrot.lane.b32.xlu2 %v112_v11, %s142_s12 }
  0x22   :  { %79 = vrot.lane.b32.xlu0 %v113_v12, %s143_s17  ;;  %85 = vrot.lane.b32.xlu1 %v114_v13, %s144_s18 }
  0x23   :  { %91 = vrot.lane.b32.xlu2 %v115_v14, %s145_s21 }
  0x5d   :  { %v32_v16 = vpop.permute.xlu2 %31  }
  0x65   :  { %v38_v17 = vpop.permute.xlu2 %37  }
  0x6d   :  { %v56_v18 = vpop.permute.xlu2 %55  }
  0x74   :  { %v8_v19 = vpop.permute.xlu0 %7   ;;  %v20_v20 = vpop.permute.xlu1 %19  }
  0x75   :  { %10 = vst.msk [vmem:[#allocation0] sm:$0x1] %vm9_vm1, %v8_v19   ;;  %v74_v21 = vpop.permute.xlu2 %73  }
  0x7c   :  { %v14_v22 = vpop.permute.xlu0 %13   ;;  %v26_v23 = vpop.permute.xlu1 %25  }
  0x7d   :  { %16 = vst.msk [vmem:[#allocation0] sm:$0x1] %vm15_vm2, %v14_v22   ;;  %v92_v24 = vpop.permute.xlu2 %91  }
  0x7e   :  { %22 = vst.msk [vmem:[#allocation0] sm:$0x1] %vm21_vm3, %v20_v20  }
  0x7f   :  { %28 = vst.msk [vmem:[#allocation0] sm:$0x1] %vm27_vm4, %v26_v23  }
  0x80   :  { %34 = vst.msk [vmem:[#allocation0] sm:$0x1] %vm33_vm5, %v32_v16  }
  0x81   :  { %40 = vst.msk [vmem:[#allocation0] sm:$0x1] %vm39_vm6, %v38_v17  }
  0x84   :  { %v44_v25 = vpop.permute.xlu0 %43   ;;  %v50_v26 = vpop.permute.xlu1 %49  }
  0x85   :  { %46 = vst.msk [vmem:[#allocation0] sm:$0x1] %vm45_vm7, %v44_v25  }
  0x86   :  { %52 = vst.msk [vmem:[#allocation0] sm:$0x1] %vm51_vm8, %v50_v26  }
  0x87   :  { %58 = vst.msk [vmem:[#allocation0] sm:$0x1] %vm57_vm9, %v56_v18  }
  0x8c   :  { %v62_v27 = vpop.permute.xlu0 %61   ;;  %v68_v28 = vpop.permute.xlu1 %67  }
  0x8d   :  { %64 = vst.msk [vmem:[#allocation0] sm:$0x1] %vm63_vm10, %v62_v27  }
  0x8e   :  { %70 = vst.msk [vmem:[#allocation0] sm:$0x1] %vm69_vm11, %v68_v28  }
  0x8f   :  { %76 = vst.msk [vmem:[#allocation0] sm:$0x1] %vm75_vm12, %v74_v21  }
  0x94   :  { %v80_v29 = vpop.permute.xlu0 %79   ;;  %v86_v30 = vpop.permute.xlu1 %85  }
  0x95   :  { %82 = vst.msk [vmem:[#allocation0] sm:$0x1] %vm81_vm13, %v80_v29  }
  0x96   :  { %88 = vst.msk [vmem:[#allocation0] sm:$0x1] %vm87_vm14, %v86_v30  }
  0x97   :  { %94 = vst.msk [vmem:[#allocation0] sm:$0x1] %vm93_vm15, %v92_v24  }
  0x9e   :  { %v97_v31 = vld [vmem:[#allocation0] sm:$0x1] }
  0x9f   :  { %100 = vst [vmem:[%s208_s1] sm:$0x1] %v97_v31 }

// kernel: residual_block_forward.2
= control target key start
LH: loop header
LB: loop body
LE: loop exit
PB: predicated region body
PF: predicated region fallthrough
CT: control target
= control target key end

     0   :  { %s867_s15 = smov 0   ;;  %s987_s0 = inlined_call_operand.vmem [shape: bf16[2,16,64], index: 0, kind: input, shape index: {}]   ;;  %s988_s1 = inlined_call_operand.vmem [shape: bf16[3,128,128], index: 1, kind: input, shape index: {}]   ;;  %s989_s2 = inlined_call_operand.vmem [shape: f32[1,128], index: 2, kind: input, shape index: {}]   ;;  %s990_s3 = inlined_call_operand.vmem [shape: bf16[2,16,128], index: 3, kind: output, shape index: {0}]   ;;  %s991_s4 = inlined_call_operand.vmem [shape: f32[2,2,128], index: 4, kind: output, shape index: {1}]  }
   0x1 LB: > { %s645_s16 = sadd.s32 4294967295, %s839_s15   ;;  %p649_p0 = scmp.ge.s32.totalorder %s839_s15, 1  ;;  %s839_s15 = sphi %s867_s15, %s15_s15  }
   0x2   : > { %p165_p1 = scmp.lt.s32.totalorder %s839_s15, 3 }
   0x4   : > { %p166_p2 = pnand %p649_p0, %p165_p1 }
   0x5   : > { %p195_p3 = scmp.lt.s32.totalorder (!%p166_p2), %s645_s16, 1 }
   0x6   : > { %169 = sbr.rel (%p166_p2) target bundleno = 210 (0xd2), region = 32 }
   0xb   : > { %v802_v0 = vld [vmem:[%s988_s1 + $0x78] sm:$0xff]  ;;  %v841_v3 = vmov 0   ;;  %v801_v4 = vld [vmem:[%s988_s1 + $0x70] sm:$0xff]  ;;  %s997_s16 = smov (!%p195_p3, %s645_s16), 1  ;;  %v800_v7 = vld [vmem:[%s988_s1 + $0x68] sm:$0xff]  ;;  %vm238_vm0 = vcmask 519168  }
   0xc   : > { %v794_v1 = vld [vmem:[%s988_s1 + $0x38] sm:$0xff]  ;;  %210 = vst [vmem:[#allocation2] sm:$0xf] %v841_v3  ;;  %357 = vmatpush.bf16.msra.mxu0 %v802_v0  ;;  %v793_v5 = vld [vmem:[%s988_s1 + $0x30] sm:$0xff]  ;;  %s785_s29 = sshll.u32 %s997_s16, 3  ;;  %v792_v8 = vld [vmem:[%s988_s1 + $0x28] sm:$0xff] }
   0xd   : > { %v810_v2 = vld [vmem:[%s988_s1 + $0xb8] sm:$0xff]  ;;  %420 = vmatpush.bf16.msra.mxu1 %v794_v1  ;;  %211 = vst [vmem:[#allocation2 + $0x4] sm:$0xf] %v841_v3  ;;  %v809_v6 = vld [vmem:[%s988_s1 + $0xb0] sm:$0xff]  ;;  %s199_s6 = scalar_lea.vmem %s987_s0, %s785_s29  ;;  %v808_v9 = vld [vmem:[%s988_s1 + $0xa8] sm:$0xff]  ;;  %vm246_vm3 = vcmask 516096   ;;  %s204_s26 = scalar_lea.vmem %s990_s3, %s785_s29 }
   0xe   : > { %508 = vmatpush.bf16.msra.mxu2 %v810_v2  ;;  %212 = vst [vmem:[#allocation2 + $0x8] sm:$0x1] %v841_v3  ;;  %vm215_vm1 = vsmask.f32 256  ;;  %vm216_vm2 = vsmask.f32 4368 }
   0xf   : > { %v213_v10 = vld [vmem:[%s199_s6] sm:$0xf]  ;;  %v214_v11 = vld [vmem:[%s199_s6 + $0x4] sm:$0xf]  ;;  %vm239_vm4 = vsmask.f32 7938  ;;  %vm917_vm5 = vmor %vm215_vm1, %vm216_vm2 }
  0x10   : > { %358 = vmatpush.bf16.msra.mxu0 %v801_v4  ;;  %v799_v12 = vld [vmem:[%s988_s1 + $0x60] sm:$0xff]  ;;  %v219_v13 = vshrl.u32 %v213_v10, 16  ;;  %v222_v14 = vshll.u32 %v213_v10, 16  ;;  %v227_v15 = vshrl.u32 %v214_v11, 16  ;;  %v230_v16 = vshll.u32 %v214_v11, 16  ;;  %vm925_vm6 = vmand %vm238_vm0, %vm239_vm4  ;;  %v798_v29 = vld [vmem:[%s988_s1 + $0x58] sm:$0xff] }
  0x11   : > { %421 = vmatpush.bf16.msra.mxu1 %v793_v5  ;;  %v791_v17 = vld [vmem:[%s988_s1 + $0x20] sm:$0xff]  ;;  %vm247_vm7 = vmand %vm246_vm3, %vm215_vm1  ;;  %v790_v30 = vld [vmem:[%s988_s1 + $0x18] sm:$0xff]  ;;  %vm455_vm8 = vcmask 1046528   ;;  %vm295_vm9 = vsmask.f32 7424  ;;  %s654_s27 = sshll.u32 %s997_s16, 1 }
  0x12   : > { %509 = vmatpush.bf16.msra.mxu2 %v809_v6  ;;  %v807_v19 = vld [vmem:[%s988_s1 + $0xa0] sm:$0xff]  ;;  %v221_v20 = vrot.slane %v219_v13, 7  ;;  %v229_v21 = vrot.slane %v227_v15, 7  ;;  %v806_v31 = vld [vmem:[%s988_s1 + $0x98] sm:$0xff]  ;;  %v797_v35 = vld [vmem:[%s988_s1 + $0x50] sm:$0xff]  ;;  %vm556_vm12 = vcmask 1040384   ;;  %s208_s30 = scalar_lea.vmem %s991_s4, %s654_s27 }
  0x13   : > { %v241_v23 = vld [vmem:[#allocation2] sm:$0xf]  ;;  %v789_v36 = vld [vmem:[%s988_s1 + $0x10] sm:$0xff]  ;;  %v796_v38 = vld [vmem:[%s988_s1 + $0x48] sm:$0xff] }
  0x14   : > { %359 = vmatpush.bf16.msra.mxu0 %v800_v7  ;;  %v224_v25 = vor.u32 %v222_v14, %v221_v20  ;;  %v225_v26 = vrot.slane %v221_v20, 4  ;;  %v232_v27 = vor.u32 %v230_v16, %v229_v21  ;;  %v234_v28 = vrot.slane %v229_v21, 4  ;;  %v805_v37 = vld [vmem:[%s988_s1 + $0x90] sm:$0xff]  ;;  %v788_v39 = vld [vmem:[%s988_s1 + $0x8] sm:$0xff]  ;;  %v795_v47 = vld [vmem:[%s988_s1 + $0x40] sm:$0xff] }
  0x15   : > { %422 = vmatpush.bf16.msra.mxu1 %v792_v8  ;;  %v248_v24 = vld [vmem:[#allocation2 + $0x8] sm:$0x1]  ;;  %v787_v48 = vld [vmem:[%s988_s1] sm:$0xff] }
  0x16   : > { %510 = vmatpush.bf16.msra.mxu2 %v808_v9  ;;  %v233_v32 = vsel %vm917_vm5, %v225_v26, %v232_v27  ;;  %v242_v33 = vsel %vm925_vm6, %v224_v25, %v241_v23  ;;  %v249_v34 = vsel %vm247_vm7, %v234_v28, %v248_v24  ;;  %v804_v40 = vld [vmem:[%s988_s1 + $0x88] sm:$0xff]  ;;  %v803_v51 = vld [vmem:[%s988_s1 + $0x80] sm:$0xff] }
  0x17   : > { %243 = vst [vmem:[#allocation2] sm:$0xf] %v242_v33  ;;  %v832_v2 = vld [vmem:[%s989_s2] ss:$0 sm:$0xff] }
  0x18   : > { %360 = vmatpush.bf16.msra.mxu0 %v799_v12  ;;  %245 = vst.msk [vmem:[#allocation2 + $0x4] sm:$0xf] %vm238_vm0, %v233_v32 }
  0x19   : > { %423 = vmatpush.bf16.msra.mxu1 %v791_v17  ;;  %250 = vst [vmem:[#allocation2 + $0x8] sm:$0x1] %v249_v34 }
  0x1a   : > { %511 = vmatpush.bf16.msra.mxu2 %v807_v19 }
  0x1c   : > { %361 = vmatpush.bf16.msra.mxu0 %v798_v29 }
  0x1d   : > { %424 = vmatpush.bf16.msra.mxu1 %v790_v30 }
  0x1e   : > { %512 = vmatpush.bf16.msra.mxu2 %v806_v31  ;;  %v821_v41 = vld [vmem:[#allocation2] sm:$0xe] }
  0x1f   : > { %v812_v42 = vld [vmem:[#allocation2] sm:$0xff]  }
  0x20   : > { %362 = vmatpush.bf16.msra.mxu0 %v797_v35  ;;  %v820_v43 = vld [vmem:[#allocation2] sm:$0xf0]  ;;  %v269_v44 = vld [vmem:[#allocation2 + $0x8] sm:$0x1]  ;;  %v299_v45 = vshll.u32 %v812_v42, 16  ;;  %v297_v50 = vshrl.u32 %v812_v42, 16 }
  0x21   : > { %425 = vmatpush.bf16.msra.mxu1 %v789_v36  ;;  %v822_v46 = vor.u32 %v821_v41, %v820_v43  ;;  %v292_v49 = vunpack.c.l.b16 %v269_v44 }
  0x22   : > { %513 = vmatpush.bf16.msra.mxu2 %v805_v37  ;;  %v301_v52 = vrot.slane %v299_v45, 1 }
  0x23   : > { %v294_v53 = vpack.c.b16 %v292_v49, %v292_v49  ;;  %v456_v54 = vrot.slane %v822_v46, 1 }
  0x24   : > { %363 = vmatpush.bf16.msra.mxu0 %v796_v38  ;;  %v302_v55 = vor.u32 %v301_v52, %v297_v50 }
  0x25   : > { %426 = vmatpush.bf16.msra.mxu1 %v788_v39  ;;  %v304_v56 = vshll.u32 %v294_v53, 16  ;;  %v457_v57 = vrot.slane %v294_v53, 1 }
  0x26   : > { %514 = vmatpush.bf16.msra.mxu2 %v804_v40 }
  0x27   : > { %v306_v58 = vrot.slane %v304_v56, 1  ;;  %v458_v59 = vsel %vm455_vm8, %v456_v54, %v457_v57 }
  0x28   : > { %364 = vmatpush.bf16.msra.mxu0 %v795_v47 }
  0x29   : > { %427 = vmatpush.bf16.msra.mxu1 %v787_v48  ;;  %v307_v60 = vsel %vm295_vm9, %v302_v55, %v306_v58 }
  0x2a   : > { %515 = vmatpush.bf16.msra.mxu2 %v803_v51 }
  0x2b   : > { %365 = vmatmul.bf16.vlgmr.msra.gmra.mxu0 %v307_v60 }
  0x2c   : > { %428 = vmatmul.bf16.vlgmr.msra.gmra.mxu1 %v812_v42 }
  0x2d   : > { %516 = vmatmul.bf16.vlgmr.msra.gmra.mxu2 %v458_v59 }
  0xa8   : > { %v366_v62 = vpop.f32.mrf.mxu0 }
  0xa9   : > { %v429_v61 = vpop.f32.mrf.mxu1 }
  0xaa   : > { %v430_v63 = vadd.f32 %v429_v61, %v366_v62 }
  0xb0   : > { %v517_v0 = vpop.f32.mrf.mxu2  ;;  %v368_v3 = vpop.f32.mrf.mxu0 }
  0xb1   : > { %v522_v1 = vadd.f32 %v517_v0, %v430_v63  ;;  %v431_v4 = vpop.f32.mrf.mxu1 }
  0xb2   : > { %v432_v6 = vadd.f32 %v431_v4, %v368_v3 }
  0xb3   : > { %v528_v5 = vadd.f32 %v832_v2, %v522_v1 }
  0xb5   : > { %v532_v8 = vmul.f32 0.01, %v528_v5  ;;  %vm530_vm10 = vcmp.gt.f32.partialorder %v528_v5, 0.0 }
  0xb7   : > { %v534_v11 = vsel %vm530_vm10, %v528_v5, %v532_v8 }
  0xb8   : > { %v519_v7 = vpop.f32.mrf.mxu2  ;;  %v547_v14 = vmul.f32 %v534_v11, %v534_v11 }
  0xb9   : > { %v523_v9 = vadd.f32 %v519_v7, %v432_v6 }
  0xbb   : > { %v529_v10 = vadd.f32 %v832_v2, %v523_v9 }
  0xbd   : > { %vm531_vm11 = vcmp.gt.f32.partialorder %v529_v10, 0.0  ;;  %v533_v12 = vmul.f32 0.01, %v529_v10 }
  0xbf   : > { %v535_v13 = vsel %vm531_vm11, %v529_v10, %v533_v12 }
  0xc0   : > { %v818_v15 = vpack.c.bf16 %v535_v13, %v534_v11  ;;  %v540_v16 = vadd.f32 %v535_v13, %v534_v11  ;;  %v548_v17 = vmul.f32 %v535_v13, %v535_v13 }
  0xc2   : > { %819 = vst [vmem:[%s204_s26] sm:$0xff] %v818_v15   ;;  %v541_v18 = vrot.slane %v540_v16, 4  ;;  %v549_v19 = vadd.f32 %v548_v17, %v547_v14 }
  0xc4   : > { %v542_v20 = vadd.f32 %v541_v18, %v540_v16  ;;  %v550_v21 = vrot.slane %v549_v19, 4 }
  0xc6   : > { %v543_v22 = vrot.slane %v542_v20, 2  ;;  %v551_v23 = vadd.f32 %v550_v21, %v549_v19 }
  0xc8   : > { %v544_v24 = vadd.f32 %v543_v22, %v542_v20  ;;  %v552_v25 = vrot.slane %v551_v23, 2 }
  0xca   : > { %v545_v26 = vrot.slane %v544_v24, 1  ;;  %v553_v27 = vadd.f32 %v552_v25, %v551_v23 }
  0xcc   : > { %v554_v28 = vrot.slane %v553_v27, 1  ;;  %v546_v29 = vadd.f32 %v545_v26, %v544_v24 }
  0xce   : > { %v555_v30 = vadd.f32 %v554_v28, %v553_v27 }
  0xd0   : > { %v557_v31 = vsel %vm556_vm12, %v546_v29, %v555_v30 }
  0xd1   : > { %558 = vst [vmem:[%s208_s30] sm:$0x3] %v557_v31 }
  0xd2 PF: > { %s15_s15 = sadd.s32 1, %s839_s15  }
  0xd3   : > { %p12_p4 = scmp.ge.s32.totalorder %s15_s15, 4  }
  0xd5   :  { %14 = sbr.rel (!%p12_p4) target bundleno = 1 (0x1), region = 76 }

// kernel: residual_block_forward.3
= control target key start
LH: loop header
LB: loop body
LE: loop exit
PB: predicated region body
PF: predicated region fallthrough
CT: control target
= control target key end

     0   :  { %s945_s21 = smov 0   ;;  %s1068_s0 = inlined_call_operand.vmem [shape: bf16[2,16,128], index: 0, kind: input, shape index: {}]   ;;  %s1069_s1 = inlined_call_operand.vmem [shape: f32[1,128], index: 1, kind: input, shape index: {}]   ;;  %s1070_s2 = inlined_call_operand.vmem [shape: f32[1,128], index: 2, kind: input, shape index: {}]   ;;  %s1071_s3 = inlined_call_operand.vmem [shape: bf16[3,128,128], index: 3, kind: input, shape index: {}]   ;;  %s1072_s4 = inlined_call_operand.vmem [shape: f32[1,128], index: 4, kind: input, shape index: {}]   ;;  %s1073_s5 = inlined_call_operand.vmem [shape: f32[2,16,128], index: 5, kind: output, shape index: {0}]   ;;  %s1074_s6 = inlined_call_operand.vmem [shape: f32[2,2,128], index: 6, kind: output, shape index: {1}]  }
   0x1 LB: > { %s712_s22 = sadd.s32 4294967295, %s907_s21   ;;  %p716_p0 = scmp.ge.s32.totalorder %s907_s21, 1  ;;  %s907_s21 = sphi %s945_s21, %s17_s21  }
   0x2   : > { %p215_p1 = scmp.lt.s32.totalorder %s907_s21, 3 }
   0x4   : > { %p216_p2 = pnand %p716_p0, %p215_p1 }
   0x5   : > { %p249_p3 = scmp.lt.s32.totalorder (!%p216_p2), %s712_s22, 1 }
   0x6   : > { %219 = sbr.rel (%p216_p2) target bundleno = 212 (0xd4), region = 40 }
   0xb   : > { %v861_v0 = vld [vmem:[%s1071_s3 + $0x38] sm:$0xff]  ;;  %v909_v3 = vmov 0   ;;  %v860_v4 = vld [vmem:[%s1071_s3 + $0x30] sm:$0xff]  ;;  %s1080_s22 = smov (!%p249_p3, %s712_s22), 1  ;;  %v859_v7 = vld [vmem:[%s1071_s3 + $0x28] sm:$0xff]  ;;  %vm308_vm1 = vcmask 1043456  }
   0xc   : > { %v877_v1 = vld [vmem:[%s1071_s3 + $0xb8] sm:$0xff]  ;;  %264 = vst [vmem:[#allocation2] sm:$0xf] %v909_v3  ;;  %489 = vmatpush.bf16.msra.mxu1 %v861_v0  ;;  %v876_v5 = vld [vmem:[%s1071_s3 + $0xb0] sm:$0xff]  ;;  %s852_s11 = sshll.u32 %s1080_s22, 3  ;;  %v875_v8 = vld [vmem:[%s1071_s3 + $0xa8] sm:$0xff] }
   0xd   : > { %v869_v2 = vld [vmem:[%s1071_s3 + $0x78] sm:$0xff]  ;;  %577 = vmatpush.bf16.msra.mxu2 %v877_v1  ;;  %265 = vst [vmem:[#allocation2 + $0x4] sm:$0xf] %v909_v3  ;;  %v868_v6 = vld [vmem:[%s1071_s3 + $0x70] sm:$0xff]  ;;  %s253_s14 = scalar_lea.vmem %s1068_s0, %s852_s11  ;;  %v867_v9 = vld [vmem:[%s1071_s3 + $0x68] sm:$0xff]  ;;  %vm315_vm4 = vcmask 1040384  }
   0xe   : > { %426 = vmatpush.bf16.msra.mxu0 %v869_v2  ;;  %266 = vst [vmem:[#allocation2 + $0x8] sm:$0x1] %v909_v3  ;;  %v879_v10 = vld [vmem:[%s253_s14] sm:$0xff]   ;;  %v857_v22 = vld [vmem:[%s1071_s3 + $0x18] sm:$0xff]  ;;  %vm286_vm0 = vsmask.f32 4368 }
   0xf   : > { %v880_v11 = vunpack.c.l.bf16 %v879_v10  ;;  %v881_v12 = vunpack.c.h.bf16 %v879_v10  ;;  %v898_v13 = vld [vmem:[%s1069_s1] ss:$0 sm:$0xff]  ;;  %v873_v23 = vld [vmem:[%s1071_s3 + $0x98] sm:$0xff]  ;;  %vm285_vm2 = vsmask.f32 256  ;;  %v856_v31 = vld [vmem:[%s1071_s3 + $0x10] sm:$0xff] }
  0x10   : > { %490 = vmatpush.bf16.msra.mxu1 %v860_v4  ;;  %v899_v14 = vld [vmem:[%s1070_s2] ss:$0 sm:$0xff]  ;;  %v865_v26 = vld [vmem:[%s1071_s3 + $0x58] sm:$0xff]  ;;  %vm309_vm3 = vsmask.f32 7938  ;;  %vm1014_vm5 = vmor %vm285_vm2, %vm286_vm0  ;;  %vm524_vm8 = vcmask 1046528  }
  0x11   : > { %578 = vmatpush.bf16.msra.mxu2 %v876_v5  ;;  %v858_v15 = vld [vmem:[%s1071_s3 + $0x20] sm:$0xff]  ;;  %v275_v17 = vmul.f32 %v898_v13, %v880_v11  ;;  %v276_v18 = vmul.f32 %v898_v13, %v881_v12  ;;  %v872_v33 = vld [vmem:[%s1071_s3 + $0x90] sm:$0xff]  ;;  %vm1025_vm6 = vmand %vm308_vm1, %vm309_vm3  ;;  %vm364_vm9 = vsmask.f32 7424  ;;  %s853_s13 = sshll.u32 %s1080_s22, 4  ;;  %s721_s17 = sshll.u32 %s1080_s22, 1 }
  0x12   : > { %427 = vmatpush.bf16.msra.mxu0 %v868_v6  ;;  %v874_v16 = vld [vmem:[%s1071_s3 + $0xa0] sm:$0xff]  ;;  %v864_v34 = vld [vmem:[%s1071_s3 + $0x50] sm:$0xff]  ;;  %vm316_vm7 = vmand %vm315_vm4, %vm285_vm2  ;;  %s258_s16 = scalar_lea.vmem %s1073_s5, %s853_s13  ;;  %s262_s20 = scalar_lea.vmem %s1074_s6, %s721_s17 }
  0x13   : > { %v866_v19 = vld [vmem:[%s1071_s3 + $0x60] sm:$0xff]  ;;  %v281_v20 = vadd.f32 %v899_v14, %v275_v17  ;;  %v282_v21 = vadd.f32 %v899_v14, %v276_v18  ;;  %v855_v44 = vld [vmem:[%s1071_s3 + $0x8] sm:$0xff] }
  0x14   : > { %491 = vmatpush.bf16.msra.mxu1 %v859_v7  ;;  %v311_v38 = vld [vmem:[#allocation2] sm:$0xf]  ;;  %v871_v45 = vld [vmem:[%s1071_s3 + $0x88] sm:$0xff] }
  0x15   : > { %579 = vmatpush.bf16.msra.mxu2 %v875_v8  ;;  %v283_v24 = vpack.c.bf16 %v281_v20, %v281_v20  ;;  %v284_v25 = vpack.c.bf16 %v282_v21, %v282_v21  ;;  %v317_v39 = vld [vmem:[#allocation2 + $0x8] sm:$0x1]  ;;  %v854_v50 = vld [vmem:[%s1071_s3] sm:$0xff] }
  0x16   : > { %428 = vmatpush.bf16.msra.mxu0 %v867_v9  ;;  %v863_v49 = vld [vmem:[%s1071_s3 + $0x48] sm:$0xff]  ;;  %v870_v51 = vld [vmem:[%s1071_s3 + $0x80] sm:$0xff] }
  0x17   : > { %v289_v27 = vshrl.u32 %v283_v24, 16  ;;  %v292_v28 = vshll.u32 %v283_v24, 16  ;;  %v297_v29 = vshrl.u32 %v284_v25, 16  ;;  %v300_v30 = vshll.u32 %v284_v25, 16  ;;  %v862_v52 = vld [vmem:[%s1071_s3 + $0x40] sm:$0xff] }
  0x18   : > { %492 = vmatpush.bf16.msra.mxu1 %v858_v15  ;;  %v900_v9 = vld [vmem:[%s1072_s4] ss:$0 sm:$0xff] }
  0x19   : > { %580 = vmatpush.bf16.msra.mxu2 %v874_v16  ;;  %v291_v35 = vrot.slane %v289_v27, 7  ;;  %v299_v36 = vrot.slane %v297_v29, 7 }
  0x1a   : > { %429 = vmatpush.bf16.msra.mxu0 %v866_v19 }
  0x1b   : > { %v294_v40 = vor.u32 %v292_v28, %v291_v35  ;;  %v295_v41 = vrot.slane %v291_v35, 4  ;;  %v302_v42 = vor.u32 %v300_v30, %v299_v36  ;;  %v304_v43 = vrot.slane %v299_v36, 4 }
  0x1c   : > { %493 = vmatpush.bf16.msra.mxu1 %v857_v22 }
  0x1d   : > { %581 = vmatpush.bf16.msra.mxu2 %v873_v23  ;;  %v303_v46 = vsel %vm1014_vm5, %v295_v41, %v302_v42  ;;  %v312_v47 = vsel %vm1025_vm6, %v294_v40, %v311_v38  ;;  %v318_v48 = vsel %vm316_vm7, %v304_v43, %v317_v39 }
  0x1e   : > { %430 = vmatpush.bf16.msra.mxu0 %v865_v26  ;;  %313 = vst [vmem:[#allocation2] sm:$0xf] %v312_v47 }
  0x1f   : > { %314 = vst [vmem:[#allocation2 + $0x4] sm:$0xf] %v303_v46 }
  0x20   : > { %494 = vmatpush.bf16.msra.mxu1 %v856_v31  ;;  %319 = vst [vmem:[#allocation2 + $0x8] sm:$0x1] %v318_v48 }
  0x21   : > { %582 = vmatpush.bf16.msra.mxu2 %v872_v33 }
  0x22   : > { %431 = vmatpush.bf16.msra.mxu0 %v864_v34 }
  0x24   : > { %495 = vmatpush.bf16.msra.mxu1 %v855_v44 }
  0x25   : > { %583 = vmatpush.bf16.msra.mxu2 %v871_v45  ;;  %v887_v53 = vld [vmem:[#allocation2] sm:$0xe] }
  0x26   : > { %432 = vmatpush.bf16.msra.mxu0 %v863_v49  ;;  %v883_v54 = vld [vmem:[#allocation2] sm:$0xff]  }
  0x27   : > { %v886_v55 = vld [vmem:[#allocation2] sm:$0xf0]  ;;  %v368_v56 = vshll.u32 %v883_v54, 16  ;;  %v338_v57 = vld [vmem:[#allocation2 + $0x8] sm:$0x1]  ;;  %v366_v59 = vshrl.u32 %v883_v54, 16 }
  0x28   : > { %496 = vmatpush.bf16.msra.mxu1 %v854_v50  ;;  %v888_v58 = vor.u32 %v887_v53, %v886_v55  ;;  %v361_v60 = vunpack.c.l.b16 %v338_v57 }
  0x29   : > { %584 = vmatpush.bf16.msra.mxu2 %v870_v51  ;;  %v370_v61 = vrot.slane %v368_v56, 1 }
  0x2a   : > { %433 = vmatpush.bf16.msra.mxu0 %v862_v52  ;;  %v363_v62 = vpack.c.b16 %v361_v60, %v361_v60  ;;  %v525_v63 = vrot.slane %v888_v58, 1 }
  0x2b   : > { %497 = vmatmul.bf16.vlgmr.msra.gmra.mxu1 %v883_v54  ;;  %v371_v1 = vor.u32 %v370_v61, %v366_v59 }
  0x2c   : > { %v526_v0 = vrot.slane %v363_v62, 1  ;;  %v373_v2 = vshll.u32 %v363_v62, 16 }
  0x2e   : > { %v527_v3 = vsel %vm524_vm8, %v525_v63, %v526_v0  ;;  %v375_v4 = vrot.slane %v373_v2, 1 }
  0x2f   : > { %585 = vmatmul.bf16.vlgmr.msra.gmra.mxu2 %v527_v3 }
  0x30   : > { %v376_v5 = vsel %vm364_vm9, %v371_v1, %v375_v4 }
  0x31   : > { %434 = vmatmul.bf16.vlgmr.msra.gmra.mxu0 %v376_v5 }
  0xa8   : > { %v498_v6 = vpop.f32.mrf.mxu1 }
  0xae   : > { %v435_v7 = vpop.f32.mrf.mxu0 }
  0xaf   : > { %v499_v8 = vadd.f32 %v498_v6, %v435_v7 }
  0xb0   : > { %v500_v15 = vpop.f32.mrf.mxu1 }
  0xb2   : > { %v586_v10 = vpop.f32.mrf.mxu2 }
  0xb3   : > { %v591_v11 = vadd.f32 %v586_v10, %v499_v8 }
  0xb5   : > { %v597_v12 = vadd.f32 %v900_v9, %v591_v11 }
  0xb6   : > { %v437_v13 = vpop.f32.mrf.mxu0 }
  0xb7   : > { %vm599_vm10 = vcmp.gt.f32.partialorder %v597_v12, 0.0  ;;  %v601_v14 = vmul.f32 0.01, %v597_v12  ;;  %v501_v17 = vadd.f32 %v500_v15, %v437_v13 }
  0xb9   : > { %v603_v16 = vsel %vm599_vm10, %v597_v12, %v601_v14 }
  0xba   : > { %605 = vst [vmem:[%s258_s16] sm:$0xff] %v603_v16  ;;  %v588_v18 = vpop.f32.mrf.mxu2  ;;  %v614_v23 = vmul.f32 %v603_v16, %v603_v16 }
  0xbb   : > { %v592_v19 = vadd.f32 %v588_v18, %v501_v17 }
  0xbd   : > { %v598_v20 = vadd.f32 %v900_v9, %v592_v19 }
  0xbf   : > { %vm600_vm11 = vcmp.gt.f32.partialorder %v598_v20, 0.0  ;;  %v602_v21 = vmul.f32 0.01, %v598_v20 }
  0xc1   : > { %v604_v22 = vsel %vm600_vm11, %v598_v20, %v602_v21 }
  0xc2   : > { %606 = vst [vmem:[%s258_s16 + $0x8] sm:$0xff] %v604_v22  ;;  %v607_v24 = vadd.f32 %v604_v22, %v603_v16  ;;  %v615_v25 = vmul.f32 %v604_v22, %v604_v22 }
  0xc4   : > { %v608_v26 = vrot.slane %v607_v24, 4  ;;  %v616_v27 = vadd.f32 %v615_v25, %v614_v23 }
  0xc6   : > { %v609_v28 = vadd.f32 %v608_v26, %v607_v24  ;;  %v617_v29 = vrot.slane %v616_v27, 4 }
  0xc8   : > { %v610_v30 = vrot.slane %v609_v28, 2  ;;  %v618_v31 = vadd.f32 %v617_v29, %v616_v27 }
  0xca   : > { %v611_v32 = vadd.f32 %v610_v30, %v609_v28  ;;  %v619_v33 = vrot.slane %v618_v31, 2 }
  0xcc   : > { %v612_v34 = vrot.slane %v611_v32, 1  ;;  %v620_v35 = vadd.f32 %v619_v33, %v618_v31 }
  0xce   : > { %v621_v36 = vrot.slane %v620_v35, 1  ;;  %v613_v37 = vadd.f32 %v612_v34, %v611_v32 }
  0xd0   : > { %v622_v38 = vadd.f32 %v621_v36, %v620_v35 }
  0xd2   : > { %v624_v39 = vsel %vm315_vm4, %v613_v37, %v622_v38 }
  0xd3   : > { %625 = vst [vmem:[%s262_s20] sm:$0x3] %v624_v39 }
  0xd4 PF: > { %s17_s21 = sadd.s32 1, %s907_s21  }
  0xd5   : > { %p14_p4 = scmp.ge.s32.totalorder %s17_s21, 4  }
  0xd7   :  { %16 = sbr.rel (!%p14_p4) target bundleno = 1 (0x1), region = 84 }

</bundles_post_ra>
